<compile_context>
chip_gen: v6e
topology: v6e:2x2x1
jax: 0.10.0
libtpu: 0.0.40
codegen_flags: <defaults>
</compile_context>

<pallas_src>
import jax
import jax.numpy as jnp
from jax.experimental import pallas as pl
from jax.experimental.pallas import tpu as pltpu


def _round_up(x, m):
    return (x + m - 1) // m * m


def mlp_decoder_kernel(x_ref, w1_ref, b1_ref, w2_ref, b2_ref, o_ref):
    # Fused: (x @ W1 + b1) -> ReLU -> (@ W2 + b2)
    # x/w1/w2 tiles are bf16 (MXU); accumulation and elementwise work are fp32.
    x = x_ref[...]                                                  # (TM, Hp) bf16
    h = jnp.dot(x, w1_ref[...], preferred_element_type=jnp.float32)  # (TM, Hp) f32
    h = jnp.maximum(h + b1_ref[...], 0.0)                           # bias+ReLU in f32
    y = jnp.dot(h.astype(jnp.bfloat16), w2_ref[...],
                preferred_element_type=jnp.float32)                 # (TM, Op) f32
    o_ref[...] = (y + b2_ref[...]).astype(o_ref.dtype)


def decoder_forward(x, w1, b1, w2, b2, *, tm_target=512):
    """x: (B, T, H) float32.  Returns (B, T, O) float32."""
    B, T, H = x.shape
    O = w2.shape[1]
    rows = B * T

    # Lane-dense padding: H and O up to multiples of 128.
    Hp = _round_up(H, 128)
    Op = _round_up(O, 128)

    # Row tile: a big multiple of 8 (sweepable); pad rows so TM | rows_p and
    # every grid step is a full, unmasked tile.
    rows8 = _round_up(rows, 8)
    TM = tm_target if rows8 >= tm_target else rows8
    rows_p = _round_up(rows, TM)
    n_tiles = rows_p // TM

    # Wrapper-side padding + single bf16 cast of matmul operands.
    x2d = jnp.zeros((rows_p, Hp), jnp.bfloat16).at[:rows, :H].set(
        x.reshape(rows, H).astype(jnp.bfloat16))
    w1_p = jnp.zeros((Hp, Hp), jnp.bfloat16).at[:H, :H].set(w1.astype(jnp.bfloat16))
    w2_p = jnp.zeros((Hp, Op), jnp.bfloat16).at[:H, :O].set(w2.astype(jnp.bfloat16))
    b1_p = jnp.zeros((1, Hp), jnp.float32).at[0, :H].set(b1)
    b2_p = jnp.zeros((1, Op), jnp.float32).at[0, :O].set(b2)

    # VMEM budget: double-buffered x/out tiles + resident (possibly
    # double-buffered) bf16 weights + biases, with headroom. Capped at 64 MiB
    # so the same config is valid on v7x.
    vmem_bytes = (2 * TM * Hp * 2          # x tiles, bf16, 2x buffered
                  + 2 * TM * Op * 4        # out tiles, f32, 2x buffered
                  + 2 * (Hp * Hp + Hp * Op) * 2  # weights, bf16
                  + 2 * (Hp + Op) * 4)     # biases, f32
    vmem_limit = min(max(int(1.5 * vmem_bytes) + (2 << 20), 8 << 20), 64 << 20)

    cost = pl.CostEstimate(
        flops=2 * rows_p * Hp * (Hp + Op),
        transcendentals=0,
        bytes_accessed=(rows_p * Hp * 2 + rows_p * Op * 4
                        + (Hp * Hp + Hp * Op) * 2 + (Hp + Op) * 4),
    )

    out2d = pl.pallas_call(
        mlp_decoder_kernel,
        out_shape=jax.ShapeDtypeStruct((rows_p, Op), jnp.float32),
        grid=(n_tiles,),
        in_specs=[
            pl.BlockSpec((TM, Hp), lambda i: (i, 0)),   # x row tile
            pl.BlockSpec((Hp, Hp), lambda i: (0, 0)),   # W1 (resident)
            pl.BlockSpec((1, Hp), lambda i: (0, 0)),    # b1 (resident)
            pl.BlockSpec((Hp, Op), lambda i: (0, 0)),   # W2 (resident)
            pl.BlockSpec((1, Op), lambda i: (0, 0)),    # b2 (resident)
        ],
        out_specs=pl.BlockSpec((TM, Op), lambda i: (i, 0)),
        compiler_params=pltpu.CompilerParams(
            dimension_semantics=("parallel",),
            vmem_limit_bytes=vmem_limit,
        ),
        cost_estimate=cost,
    )(x2d, w1_p, b1_p, w2_p, b2_p)

    return out2d[:rows, :O].reshape(B, T, O)


def reference_forward(x, w1, b1, w2, b2):
    # Matches the kernel's numerics: bf16 matmul operands, fp32 accumulation
    # and fp32 elementwise (bias add / ReLU).
    xb = x.astype(jnp.bfloat16)
    h = jnp.einsum("bth,hk->btk", xb, w1.astype(jnp.bfloat16),
                   preferred_element_type=jnp.float32) + b1
    h = jnp.maximum(h, 0.0)
    y = jnp.einsum("btk,ko->bto", h.astype(jnp.bfloat16), w2.astype(jnp.bfloat16),
                   preferred_element_type=jnp.float32) + b2
    return y


if __name__ == "__main__":
    key = jax.random.PRNGKey(0)
    k_x, k_w1, k_b1, k_w2, k_b2 = jax.random.split(key, 5)

    B, T, H, O = 2, 8, 32, 32
    x = jax.random.normal(k_x, (B, T, H), dtype=jnp.float32)

    # Deterministic synthetic parameters (PyTorch nn.Linear-like scale).
    w1 = jax.random.uniform(k_w1, (H, H), jnp.float32, -1.0, 1.0) / jnp.sqrt(H)
    b1 = jax.random.uniform(k_b1, (H,), jnp.float32, -1.0, 1.0) / jnp.sqrt(H)
    w2 = jax.random.uniform(k_w2, (H, O), jnp.float32, -1.0, 1.0) / jnp.sqrt(H)
    b2 = jax.random.uniform(k_b2, (O,), jnp.float32, -1.0, 1.0) / jnp.sqrt(H)

    out = decoder_forward(x, w1, b1, w2, b2)
    jax.block_until_ready(out)

    ref = reference_forward(x, w1, b1, w2, b2)
    assert out.shape == (B, T, O)
    assert jnp.allclose(out, ref, atol=1e-3, rtol=1e-3), (
        float(jnp.max(jnp.abs(out - ref))))

    print("KERNEL_OK")
</pallas_src>

<mosaic_0001>
module attributes {stable_mosaic.version = 11 : i64} {
  func.func @mlp_decoder_kernel(%arg0: i32, %arg1: memref<16x128xbf16, #tpu.memory_space<vmem>>, %arg2: memref<128x128xbf16, #tpu.memory_space<vmem>>, %arg3: memref<1x128xf32, #tpu.memory_space<vmem>>, %arg4: memref<128x128xbf16, #tpu.memory_space<vmem>>, %arg5: memref<1x128xf32, #tpu.memory_space<vmem>>, %arg6: memref<16x128xf32, #tpu.memory_space<vmem>>) attributes {dimension_semantics = [#tpu.dimension_semantics<parallel>], iteration_bounds = array<i64: 1>, scalar_prefetch = 0 : i64, scratch_operands = 0 : i64, tpu.core_type = #tpu.core_type<tc>, window_params = [{transform_indices = @transform_0, window_bounds = array<i64: 16, 128>}, {pipeline_mode = #tpu.pipeline_mode<synchronous>, transform_indices = @transform_1, window_bounds = array<i64: 128, 128>}, {pipeline_mode = #tpu.pipeline_mode<synchronous>, transform_indices = @transform_2, window_bounds = array<i64: 1, 128>}, {pipeline_mode = #tpu.pipeline_mode<synchronous>, transform_indices = @transform_3, window_bounds = array<i64: 128, 128>}, {pipeline_mode = #tpu.pipeline_mode<synchronous>, transform_indices = @transform_4, window_bounds = array<i64: 1, 128>}, {transform_indices = @transform_5, window_bounds = array<i64: 16, 128>}]} {
    %c0 = arith.constant 0 : index
    %c0_0 = arith.constant 0 : index
    %0 = vector.load %arg1[%c0, %c0_0] : memref<16x128xbf16, #tpu.memory_space<vmem>>, vector<16x128xbf16>
    %c0_1 = arith.constant 0 : index
    %c0_2 = arith.constant 0 : index
    %1 = vector.load %arg2[%c0_1, %c0_2] : memref<128x128xbf16, #tpu.memory_space<vmem>>, vector<128x128xbf16>
    %cst = arith.constant dense<0.000000e+00> : vector<16x128xf32>
    %2 = tpu.matmul %0, %1, %cst {dimension_numbers = #tpu.dot_dimension_numbers<[1], [0], [0], [1], [0, 0, 1, 1], [], []>} : vector<16x128xbf16>, vector<128x128xbf16>, vector<16x128xf32> -> vector<16x128xf32>
    %c0_3 = arith.constant 0 : index
    %c0_4 = arith.constant 0 : index
    %3 = vector.load %arg3[%c0_3, %c0_4] : memref<1x128xf32, #tpu.memory_space<vmem>>, vector<1x128xf32>
    %4 = vector.broadcast %3 : vector<1x128xf32> to vector<16x128xf32>
    %5 = arith.addf %2, %4 : vector<16x128xf32>
    %cst_5 = arith.constant 0.000000e+00 : f32
    %6 = vector.broadcast %cst_5 : f32 to vector<16x128xf32>
    %7 = arith.maximumf %5, %6 : vector<16x128xf32>
    %8 = arith.truncf %7 : vector<16x128xf32> to vector<16x128xbf16>
    %c0_6 = arith.constant 0 : index
    %c0_7 = arith.constant 0 : index
    %9 = vector.load %arg4[%c0_6, %c0_7] : memref<128x128xbf16, #tpu.memory_space<vmem>>, vector<128x128xbf16>
    %cst_8 = arith.constant dense<0.000000e+00> : vector<16x128xf32>
    %10 = tpu.matmul %8, %9, %cst_8 {dimension_numbers = #tpu.dot_dimension_numbers<[1], [0], [0], [1], [0, 0, 1, 1], [], []>} : vector<16x128xbf16>, vector<128x128xbf16>, vector<16x128xf32> -> vector<16x128xf32>
    %c0_9 = arith.constant 0 : index
    %c0_10 = arith.constant 0 : index
    %11 = vector.load %arg5[%c0_9, %c0_10] : memref<1x128xf32, #tpu.memory_space<vmem>>, vector<1x128xf32>
    %12 = vector.broadcast %11 : vector<1x128xf32> to vector<16x128xf32>
    %13 = arith.addf %10, %12 : vector<16x128xf32>
    %c0_11 = arith.constant 0 : index
    %c0_12 = arith.constant 0 : index
    %14 = vector.load %arg6[%c0_11, %c0_12] : memref<16x128xf32, #tpu.memory_space<vmem>>, vector<16x128xf32>
    tpu.vector_store %arg6[%c0_11, %c0_12], %13 {strides = array<i32>} : memref<16x128xf32, #tpu.memory_space<vmem>>, vector<16x128xf32>,
    return
  }
  func.func @transform_0(%arg0: i32) -> (i32, i32) {
    %c0_i32 = arith.constant 0 : i32
    %c0_i32_0 = arith.constant 0 : i32
    return %arg0, %c0_i32 : i32, i32
  }
  func.func @transform_1(%arg0: i32) -> (i32, i32) {
    %c0_i32 = arith.constant 0 : i32
    %c0_i32_0 = arith.constant 0 : i32
    %c0_i32_1 = arith.constant 0 : i32
    return %c0_i32, %c0_i32_0 : i32, i32
  }
  func.func @transform_2(%arg0: i32) -> (i32, i32) {
    %c0_i32 = arith.constant 0 : i32
    %c0_i32_0 = arith.constant 0 : i32
    %c0_i32_1 = arith.constant 0 : i32
    return %c0_i32, %c0_i32_0 : i32, i32
  }
  func.func @transform_3(%arg0: i32) -> (i32, i32) {
    %c0_i32 = arith.constant 0 : i32
    %c0_i32_0 = arith.constant 0 : i32
    %c0_i32_1 = arith.constant 0 : i32
    return %c0_i32, %c0_i32_0 : i32, i32
  }
  func.func @transform_4(%arg0: i32) -> (i32, i32) {
    %c0_i32 = arith.constant 0 : i32
    %c0_i32_0 = arith.constant 0 : i32
    %c0_i32_1 = arith.constant 0 : i32
    return %c0_i32, %c0_i32_0 : i32, i32
  }
  func.func @transform_5(%arg0: i32) -> (i32, i32) {
    %c0_i32 = arith.constant 0 : i32
    %c0_i32_0 = arith.constant 0 : i32
    return %arg0, %c0_i32 : i32, i32
  }
}

</mosaic_0001>

<bundles_post_ra>
// kernel: tpu_custom_call.1
= control target key start
LH: loop header
LB: loop body
LE: loop exit
PB: predicated region body
PF: predicated region fallthrough
CT: control target
= control target key end

     0   :  { %10 = vsyncpa [#allocation3], 0  ;;  %s566_s0 = inlined_call_operand.hbm [shape: bf16[16,128], index: 0, kind: input, shape index: {}]   ;;  %s567_s1 = inlined_call_operand.hbm [shape: bf16[128,128], index: 1, kind: input, shape index: {}]   ;;  %s568_s2 = inlined_call_operand.vmem [shape: f32[1,128], index: 2, kind: input, shape index: {}]   ;;  %s569_s3 = inlined_call_operand.hbm [shape: bf16[128,128], index: 3, kind: input, shape index: {}]   ;;  %s570_s4 = inlined_call_operand.vmem [shape: f32[1,128], index: 4, kind: input, shape index: {}]   ;;  %s571_s5 = inlined_call_operand.hbm [shape: f32[16,128], index: 5, kind: output, shape index: {}]  }
   0x1   :  { %11 = vsyncpa [#allocation6], 0 }
   0x2   :  { %12 = vsyncpa [#allocation4], 0  ;;  %s508_s18 = smov [#allocation5]   ;;  %s509_s20 = smov [#allocation2]  }
   0x3   :  { %s30_s19 = sshll.u32 %s508_s18, 4  ;;  %s18_s21 = sshll.u32 %s509_s20, 4  ;;  %s31_s19 = int_to_ptr.vmem [resolvable:$true] %s30_s19  ;;  %s19_s21 = int_to_ptr.vmem [resolvable:$true] %s18_s21 }
   0x4   :  { %s430_s22 = scalar_lea.vmem %s31_s19, 1024  ;;  %p435_p1 = scmp.lt.s32.totalorder %s31_s19, %s31_s19 }
   0x5   :  { %p431_p0 = scmp.ne.s32.totalorder %s31_s19, %s430_s22  ;;  %p436_p2 = scmp.lt.s32.totalorder %s430_s22, %s430_s22 }
   0x7   :  { %p437_p3 = por %p436_p2, %p435_p1 }
   0x9   :  { %p438_p4 = pnand %p437_p3, %p431_p0 }
   0xb   :  { %441 = shalt.err (!%p438_p4)
}
   0xc   :  { %s510_s23 = smov 64   ;;  %s511_s24 = smov 4  }
   0xd   :  { %36 = dma.hbm_to_vmem [thread:$0]  %s567_s1, 1024, %s31_s19, [#allocation6], %s510_s23, %s510_s23, %s511_s24  }
   0xe   :  { %s450_s27 = scalar_lea.vmem %s19_s21, 128  ;;  %p455_p6 = scmp.lt.s32.totalorder %s19_s21, %s19_s21 }
   0xf   :  { %p451_p5 = scmp.ne.s32.totalorder %s19_s21, %s450_s27  ;;  %p456_p7 = scmp.lt.s32.totalorder %s450_s27, %s450_s27 }
  0x11   :  { %p457_p8 = por %p456_p7, %p455_p6 }
  0x13   :  { %p458_p9 = pnand %p457_p8, %p451_p5 }
  0x15   :  { %461 = shalt.err (!%p458_p9)
}
  0x16   :  { %24 = dma.hbm_to_vmem [thread:$0]  %s566_s0, 128, %s19_s21, [#allocation3], %s510_s23, %s510_s23, %s511_s24  }
  0x17   :  { %s512_s30 = smov [#allocation7]  }
  0x18   :  { %s44_s6 = sshll.u32 %s512_s30, 4  ;;  %s45_s6 = int_to_ptr.vmem [resolvable:$true] %s44_s6 }
  0x19   :  { %s470_s7 = scalar_lea.vmem %s45_s6, 1024  ;;  %p475_p11 = scmp.lt.s32.totalorder %s45_s6, %s45_s6 }
  0x1a   :  { %p471_p10 = scmp.ne.s32.totalorder %s45_s6, %s470_s7  ;;  %p476_p12 = scmp.lt.s32.totalorder %s470_s7, %s470_s7 }
  0x1c   :  { %p477_p13 = por %p476_p12, %p475_p11 }
  0x1e   :  { %p478_p0 = pnand %p477_p13, %p471_p10 }
  0x20   :  { %481 = shalt.err (!%p478_p0)
}
  0x21   :  { %50 = dma.hbm_to_vmem [thread:$0]  %s569_s3, 1024, %s45_s6, [#allocation6], %s510_s23, %s510_s23, %s511_s24  }
  0x22   :  { %502 = dma.done.wait [#allocation3], 128  }
  0x23   :  { %503 = vsyncadd [#allocation3], 4294967168 }
  0x24   :  { %504 = dma.done.wait [#allocation6], 2048  }
  0x25   :  { %505 = vsyncadd [#allocation6], 4294965248  ;;  %v513_v0 = vmov 0.0   ;;  %vm514_vm0 = vmmov 0   ;;  %v405_v1 = vld [vmem:[#allocation5 + $0x38] sm:$0xff]   ;;  %v406_v2 = vld [vmem:[#allocation5 + $0x30] sm:$0xff]  }
  0x26   :  { %355 = vmatprep.subr.bf16.mxu0 %v513_v0  ;;  %371 = vmatprep.mubr.msk.bf16.mxu0 %vm514_vm0, %v513_v0  ;;  %v407_v3 = vld [vmem:[#allocation5 + $0x28] sm:$0xff]   ;;  %v414_v4 = vld [vmem:[#allocation7 + $0x38] sm:$0xff]   ;;  %v408_v5 = vld [vmem:[#allocation5 + $0x20] sm:$0xff]   ;;  %s515_s11 = smov [#allocation8]  }
  0x27   :  { %375 = vmatprep.subr.bf16.mxu1 %v513_v0  ;;  %391 = vmatprep.mubr.msk.bf16.mxu1 %vm514_vm0, %v513_v0  ;;  %v415_v6 = vld [vmem:[#allocation7 + $0x30] sm:$0xff]   ;;  %v409_v7 = vld [vmem:[#allocation5 + $0x18] sm:$0xff]   ;;  %v416_v8 = vld [vmem:[#allocation7 + $0x28] sm:$0xff]   ;;  %s305_s12 = sshll.u32 %s515_s11, 4  ;;  %s306_s12 = int_to_ptr.vmem [resolvable:$true] %s305_s12 }
  0x28   :  { %356 = vmatpush3.bf16.msra.mxu0 %v405_v1  ;;  %376 = vmatpush3.bf16.msra.mxu1 %v414_v4  ;;  %v410_v9 = vld [vmem:[#allocation5 + $0x10] sm:$0xff]   ;;  %v417_v10 = vld [vmem:[#allocation7 + $0x20] sm:$0xff]   ;;  %v411_v11 = vld [vmem:[#allocation5 + $0x8] sm:$0xff]   ;;  %p487_p2 = scmp.lt.s32.totalorder %s306_s12, %s306_s12 }
  0x29   :  { %357 = vmatprep.subr.bf16.mxu0 %v513_v0  ;;  %377 = vmatprep.subr.bf16.mxu1 %v513_v0  ;;  %v418_v12 = vld [vmem:[#allocation7 + $0x18] sm:$0xff]   ;;  %v412_v13 = vld [vmem:[#allocation5] sm:$0xff]   ;;  %v419_v15 = vld [vmem:[#allocation7 + $0x10] sm:$0xff]  }
  0x2a   :  { %v413_v14 = vld [vmem:[#allocation2] sm:$0xff]   ;;  %v420_v16 = vld [vmem:[#allocation7 + $0x8] sm:$0xff]   ;;  %v421_v17 = vld [vmem:[#allocation7] sm:$0xff]  }
  0x2b   :  { %v318_v18 = vld [vmem:[%s568_s2] ss:$0 sm:$0xff]  ;;  %s482_s2 = scalar_lea.vmem %s306_s12, 256 }
  0x2c   :  { %358 = vmatpush3.bf16.msra.mxu0 %v406_v2  ;;  %378 = vmatpush3.bf16.msra.mxu1 %v415_v6  ;;  %v328_v28 = vld [vmem:[%s570_s4] ss:$0 sm:$0xff]  ;;  %p483_p1 = scmp.ne.s32.totalorder %s306_s12, %s482_s2  ;;  %p488_p3 = scmp.lt.s32.totalorder %s482_s2, %s482_s2 }
  0x2d   :  { %359 = vmatprep.subr.bf16.mxu0 %v513_v0  ;;  %379 = vmatprep.subr.bf16.mxu1 %v513_v0 }
  0x2e   :  { %p489_p4 = por %p488_p3, %p487_p2 }
  0x30   :  { %360 = vmatpush3.bf16.msra.mxu0 %v407_v3  ;;  %380 = vmatpush3.bf16.msra.mxu1 %v416_v8  ;;  %p490_p5 = pnand %p489_p4, %p483_p1 }
  0x31   :  { %361 = vmatprep.subr.bf16.mxu0 %v513_v0  ;;  %381 = vmatprep.subr.bf16.mxu1 %v513_v0 }
  0x34   :  { %362 = vmatpush3.bf16.msra.mxu0 %v408_v5  ;;  %382 = vmatpush3.bf16.msra.mxu1 %v417_v10 }
  0x35   :  { %363 = vmatprep.subr.bf16.mxu0 %v513_v0  ;;  %383 = vmatprep.subr.bf16.mxu1 %v513_v0 }
  0x38   :  { %364 = vmatpush3.bf16.msra.mxu0 %v409_v7  ;;  %384 = vmatpush3.bf16.msra.mxu1 %v418_v12 }
  0x39   :  { %365 = vmatprep.subr.bf16.mxu0 %v513_v0  ;;  %385 = vmatprep.subr.bf16.mxu1 %v513_v0 }
  0x3c   :  { %366 = vmatpush3.bf16.msra.mxu0 %v410_v9  ;;  %386 = vmatpush3.bf16.msra.mxu1 %v419_v15 }
  0x3d   :  { %367 = vmatprep.subr.bf16.mxu0 %v513_v0  ;;  %387 = vmatprep.subr.bf16.mxu1 %v513_v0 }
  0x40   :  { %368 = vmatpush3.bf16.msra.mxu0 %v411_v11  ;;  %388 = vmatpush3.bf16.msra.mxu1 %v420_v16 }
  0x41   :  { %369 = vmatprep.subr.bf16.mxu0 %v513_v0  ;;  %389 = vmatprep.subr.bf16.mxu1 %v513_v0 }
  0x44   :  { %370 = vmatpush3.bf16.msra.mxu0 %v412_v13  ;;  %390 = vmatpush3.bf16.msra.mxu1 %v421_v17 }
  0x47   :  { %372 = vmatmul.mubr.bf16.vlgmr.msra.gmra.mxu0 %v413_v14 }
 0x107   :  { %v176_v19 = vpop.f32.mrf.mxu0 }
 0x108   :  { %v177_v21 = vadd.f32 %v318_v18, %v176_v19 }
 0x109   :  { %v373_v20 = vpop.f32.mrf.mxu0 }
 0x10a   :  { %v183_v25 = vmax.f32 %v177_v21, 0.0 }
 0x10b   :  { %v179_v22 = vpop.f32.mrf.mxu0 }
 0x10c   :  { %v180_v23 = vadd.f32 %v318_v18, %v179_v22 }
 0x10d   :  { %v374_v24 = vpop.f32.mrf.mxu0 }
 0x10e   :  { %v184_v26 = vmax.f32 %v180_v23, 0.0 }
 0x110   :  { %v185_v27 = vpack.c.bf16 %v184_v26, %v183_v25 }
 0x112   :  { %392 = vmatmul.mubr.bf16.vlgmr.msra.gmra.mxu1 %v185_v27 }
 0x1d2   :  { %v291_v29 = vpop.f32.mrf.mxu1 }
 0x1d3   :  { %v292_v30 = vadd.f32 %v328_v28, %v291_v29 }
 0x1d4   :  { %v393_v31 = vpop.f32.mrf.mxu1 }
 0x1d5   :  { %298 = vst [vmem:[#allocation8] sm:$0xff] %v292_v30 }
 0x1d6   :  { %v294_v32 = vpop.f32.mrf.mxu1 }
 0x1d7   :  { %v295_v33 = vadd.f32 %v328_v28, %v294_v32 }
 0x1d8   :  { %v394_v34 = vpop.f32.mrf.mxu1 }
 0x1d9   :  { %299 = vst [vmem:[#allocation8 + $0x8] sm:$0xff] %v295_v33 }
 0x1da   :  { %493 = shalt.err (!%p490_p5)
}
 0x1db   :  { %s516_s13 = smov 128   ;;  %s517_s4 = smov 8  }
 0x1dc   :  { %311 = dma.vmem_to_hbm [thread:$0]  %s306_s12, 256, %s571_s5, [#allocation4], %s516_s13, %s516_s13, %s517_s4  }
 0x1dd   :  { %506 = dma.done.wait [#allocation4], 256  }
 0x1de   :  { %507 = vsyncadd [#allocation4], 4294967040 }
 0x1df   :  { %315 = vsyncpa [#allocation3], 1 }
 0x1e0   :  { %316 = vsyncpa [#allocation6], 1 }
 0x1e1   :  { %317 = vsyncpa [#allocation4], 1 }

</bundles_post_ra>
